<compile_context>
chip_gen: v7x
topology: tpu7x:2x2x1
jax: 0.10.0
libtpu: 0.0.40
codegen_flags: <defaults>
</compile_context>

<pallas_src>
import math
import functools

import jax
import jax.numpy as jnp
from jax.experimental import pallas as pl
from jax.experimental.pallas import tpu as pltpu


def _round_up(x, m):
    return ((x + m - 1) // m) * m


def _mlp_kernel(x_ref, w1_ref, b1_ref, w2_ref, b2_ref, o_ref):
    # First linear (MXU, f32 accumulation) + bias + ReLU epilogue on the VPU.
    h = jnp.dot(x_ref[...], w1_ref[...], preferred_element_type=jnp.float32)
    h = jnp.maximum(h + b1_ref[...], 0.0)
    # Second linear: intermediate downcast to the weight dtype (bf16) feeds the
    # MXU at full rate; accumulation stays f32.
    y = jnp.dot(h.astype(w2_ref.dtype), w2_ref[...],
                preferred_element_type=jnp.float32)
    o_ref[...] = (y + b2_ref[...]).astype(o_ref.dtype)


def mlp_forward(x, w1, b1, w2, b2, *, block_b=256, compute_dtype=jnp.bfloat16):
    """Fused MLP forward.

    x:(B,Din)  w1:(Din,H)  b1:(1,H)  w2:(H,O)  b2:(1,O)
    Returns (x, y) matching the PyTorch module's forward.
    """
    B, din = x.shape
    H = w1.shape[1]
    O = w2.shape[1]
    out_dtype = x.dtype

    # Lane-dense padding (multiples of 128 on the last dim of every operand).
    din_p = _round_up(din, 128)
    h_p = _round_up(H, 128)
    o_p = _round_up(O, 128)

    # Batch tile: multiple of 16 sublanes (safe for bf16 packing), capped at
    # block_b; batch is padded up to a whole number of tiles.
    tb = min(block_b, _round_up(B, 16))
    b_p = _round_up(B, tb)

    # Pad + cast operands. Zero-padding is exact: zero rows/cols of the weights
    # contribute nothing, ReLU(0)=0, and padded outputs are sliced off below.
    xp = jnp.zeros((b_p, din_p), compute_dtype).at[:B, :din].set(
        x.astype(compute_dtype))
    w1p = jnp.zeros((din_p, h_p), compute_dtype).at[:din, :H].set(
        w1.astype(compute_dtype))
    b1p = jnp.zeros((1, h_p), jnp.float32).at[:, :H].set(b1.astype(jnp.float32))
    w2p = jnp.zeros((h_p, o_p), compute_dtype).at[:H, :O].set(
        w2.astype(compute_dtype))
    b2p = jnp.zeros((1, o_p), jnp.float32).at[:, :O].set(b2.astype(jnp.float32))

    grid = (b_p // tb,)

    itemsize = jnp.dtype(compute_dtype).itemsize
    cost = pl.CostEstimate(
        flops=2 * b_p * din_p * h_p + 2 * b_p * h_p * o_p,
        transcendentals=0,
        bytes_accessed=(b_p * din_p * itemsize
                        + din_p * h_p * itemsize
                        + h_p * o_p * itemsize
                        + b_p * o_p * jnp.dtype(out_dtype).itemsize),
    )

    y = pl.pallas_call(
        _mlp_kernel,
        out_shape=jax.ShapeDtypeStruct((b_p, o_p), out_dtype),
        grid_spec=pltpu.PrefetchScalarGridSpec(
            num_scalar_prefetch=0,
            grid=grid,
            in_specs=[
                # x: batch-tiled, double-buffered by the Pallas pipeline.
                pl.BlockSpec((tb, din_p), lambda i: (i, 0)),
                # Weights / biases: constant index_map -> VMEM-resident.
                pl.BlockSpec((din_p, h_p), lambda i: (0, 0)),
                pl.BlockSpec((1, h_p), lambda i: (0, 0)),
                pl.BlockSpec((h_p, o_p), lambda i: (0, 0)),
                pl.BlockSpec((1, o_p), lambda i: (0, 0)),
            ],
            out_specs=pl.BlockSpec((tb, o_p), lambda i: (i, 0)),
        ),
        compiler_params=pltpu.CompilerParams(
            dimension_semantics=("parallel",),   # shard batch tiles across TCs
            vmem_limit_bytes=48 * 1024 * 1024,   # safe on v7x (64 MiB physical)
        ),
        cost_estimate=cost,
    )(xp, w1p, b1p, w2p, b2p)

    # Module forward returns (x, layers(x)); slice off the padding.
    return x, y[:B, :O]


def init_mlp_params(key, input_dim, hidden_dim, out_dim, dtype=jnp.float32):
    """Deterministic init mirroring nn.Linear's kaiming-uniform-style bounds.

    Weights are stored transposed relative to PyTorch: (in_features, out_features).
    """
    k1, k2, k3, k4 = jax.random.split(key, 4)
    bound1 = 1.0 / math.sqrt(input_dim)
    bound2 = 1.0 / math.sqrt(hidden_dim)
    w1 = jax.random.uniform(k1, (input_dim, hidden_dim), dtype,
                            minval=-bound1, maxval=bound1)
    b1 = jax.random.uniform(k2, (1, hidden_dim), dtype,
                            minval=-bound1, maxval=bound1)
    w2 = jax.random.uniform(k3, (hidden_dim, out_dim), dtype,
                            minval=-bound2, maxval=bound2)
    b2 = jax.random.uniform(k4, (1, out_dim), dtype,
                            minval=-bound2, maxval=bound2)
    return w1, b1, w2, b2


if __name__ == "__main__":
    key = jax.random.PRNGKey(0)
    kx, kp = jax.random.split(key)

    batch, input_dim, hidden_dim, out_dim = 8, 32, 64, 16
    x = jax.random.normal(kx, (batch, input_dim), jnp.float32)
    w1, b1, w2, b2 = init_mlp_params(kp, input_dim, hidden_dim, out_dim)

    # Reference in plain JAX (f32).
    y_ref = jnp.maximum(x @ w1 + b1, 0.0) @ w2 + b2

    # 1) Optimized bf16-compute path (f32 accumulation) — loose tolerance.
    fwd_bf16 = jax.jit(functools.partial(mlp_forward, compute_dtype=jnp.bfloat16))
    x_out, y_bf16 = fwd_bf16(x, w1, b1, w2, b2)
    jax.block_until_ready((x_out, y_bf16))
    assert x_out.shape == x.shape and jnp.allclose(x_out, x), "identity branch mismatch"
    assert y_bf16.shape == y_ref.shape, "output shape mismatch"
    assert jnp.allclose(y_bf16, y_ref, atol=3e-2, rtol=3e-2), "bf16 mlp branch mismatch"

    # 2) f32-compute path — tight tolerance (exact-semantics check of the kernel).
    fwd_f32 = jax.jit(functools.partial(mlp_forward, compute_dtype=jnp.float32))
    _, y_f32 = fwd_f32(x, w1, b1, w2, b2)
    jax.block_until_ready(y_f32)
    assert jnp.allclose(y_f32, y_ref, atol=1e-5, rtol=1e-5), "f32 mlp branch mismatch"

    print("KERNEL_OK")
</pallas_src>

<mosaic_0001>
module attributes {stable_mosaic.version = 11 : i64} {
  func.func @_mlp_kernel(%arg0: i32, %arg1: memref<16x128xbf16, #tpu.memory_space<vmem>>, %arg2: memref<128x128xbf16, #tpu.memory_space<vmem>>, %arg3: memref<1x128xf32, #tpu.memory_space<vmem>>, %arg4: memref<128x128xbf16, #tpu.memory_space<vmem>>, %arg5: memref<1x128xf32, #tpu.memory_space<vmem>>, %arg6: memref<16x128xf32, #tpu.memory_space<vmem>>) attributes {dimension_semantics = [#tpu.dimension_semantics<parallel>], iteration_bounds = array<i64: 1>, scalar_prefetch = 0 : i64, scratch_operands = 0 : i64, tpu.core_type = #tpu.core_type<tc>, window_params = [{transform_indices = @transform_0, window_bounds = array<i64: 16, 128>}, {pipeline_mode = #tpu.pipeline_mode<synchronous>, transform_indices = @transform_1, window_bounds = array<i64: 128, 128>}, {pipeline_mode = #tpu.pipeline_mode<synchronous>, transform_indices = @transform_2, window_bounds = array<i64: 1, 128>}, {pipeline_mode = #tpu.pipeline_mode<synchronous>, transform_indices = @transform_3, window_bounds = array<i64: 128, 128>}, {pipeline_mode = #tpu.pipeline_mode<synchronous>, transform_indices = @transform_4, window_bounds = array<i64: 1, 128>}, {transform_indices = @transform_5, window_bounds = array<i64: 16, 128>}]} {
    %c0 = arith.constant 0 : index
    %c0_0 = arith.constant 0 : index
    %0 = vector.load %arg1[%c0, %c0_0] : memref<16x128xbf16, #tpu.memory_space<vmem>>, vector<16x128xbf16>
    %c0_1 = arith.constant 0 : index
    %c0_2 = arith.constant 0 : index
    %1 = vector.load %arg2[%c0_1, %c0_2] : memref<128x128xbf16, #tpu.memory_space<vmem>>, vector<128x128xbf16>
    %cst = arith.constant dense<0.000000e+00> : vector<16x128xf32>
    %2 = tpu.matmul %0, %1, %cst {dimension_numbers = #tpu.dot_dimension_numbers<[1], [0], [0], [1], [0, 0, 1, 1], [], []>} : vector<16x128xbf16>, vector<128x128xbf16>, vector<16x128xf32> -> vector<16x128xf32>
    %c0_3 = arith.constant 0 : index
    %c0_4 = arith.constant 0 : index
    %3 = vector.load %arg3[%c0_3, %c0_4] : memref<1x128xf32, #tpu.memory_space<vmem>>, vector<1x128xf32>
    %4 = vector.broadcast %3 : vector<1x128xf32> to vector<16x128xf32>
    %5 = arith.addf %2, %4 : vector<16x128xf32>
    %cst_5 = arith.constant 0.000000e+00 : f32
    %6 = vector.broadcast %cst_5 : f32 to vector<16x128xf32>
    %7 = arith.maximumf %5, %6 : vector<16x128xf32>
    %8 = arith.truncf %7 : vector<16x128xf32> to vector<16x128xbf16>
    %c0_6 = arith.constant 0 : index
    %c0_7 = arith.constant 0 : index
    %9 = vector.load %arg4[%c0_6, %c0_7] : memref<128x128xbf16, #tpu.memory_space<vmem>>, vector<128x128xbf16>
    %cst_8 = arith.constant dense<0.000000e+00> : vector<16x128xf32>
    %10 = tpu.matmul %8, %9, %cst_8 {dimension_numbers = #tpu.dot_dimension_numbers<[1], [0], [0], [1], [0, 0, 1, 1], [], []>} : vector<16x128xbf16>, vector<128x128xbf16>, vector<16x128xf32> -> vector<16x128xf32>
    %c0_9 = arith.constant 0 : index
    %c0_10 = arith.constant 0 : index
    %11 = vector.load %arg5[%c0_9, %c0_10] : memref<1x128xf32, #tpu.memory_space<vmem>>, vector<1x128xf32>
    %12 = vector.broadcast %11 : vector<1x128xf32> to vector<16x128xf32>
    %13 = arith.addf %10, %12 : vector<16x128xf32>
    %c0_11 = arith.constant 0 : index
    %c0_12 = arith.constant 0 : index
    %14 = vector.load %arg6[%c0_11, %c0_12] : memref<16x128xf32, #tpu.memory_space<vmem>>, vector<16x128xf32>
    tpu.vector_store %arg6[%c0_11, %c0_12], %13 {strides = array<i32>} : memref<16x128xf32, #tpu.memory_space<vmem>>, vector<16x128xf32>,
    return
  }
  func.func @transform_0(%arg0: i32) -> (i32, i32) {
    %c0_i32 = arith.constant 0 : i32
    %c0_i32_0 = arith.constant 0 : i32
    return %arg0, %c0_i32 : i32, i32
  }
  func.func @transform_1(%arg0: i32) -> (i32, i32) {
    %c0_i32 = arith.constant 0 : i32
    %c0_i32_0 = arith.constant 0 : i32
    %c0_i32_1 = arith.constant 0 : i32
    return %c0_i32, %c0_i32_0 : i32, i32
  }
  func.func @transform_2(%arg0: i32) -> (i32, i32) {
    %c0_i32 = arith.constant 0 : i32
    %c0_i32_0 = arith.constant 0 : i32
    %c0_i32_1 = arith.constant 0 : i32
    return %c0_i32, %c0_i32_0 : i32, i32
  }
  func.func @transform_3(%arg0: i32) -> (i32, i32) {
    %c0_i32 = arith.constant 0 : i32
    %c0_i32_0 = arith.constant 0 : i32
    %c0_i32_1 = arith.constant 0 : i32
    return %c0_i32, %c0_i32_0 : i32, i32
  }
  func.func @transform_4(%arg0: i32) -> (i32, i32) {
    %c0_i32 = arith.constant 0 : i32
    %c0_i32_0 = arith.constant 0 : i32
    %c0_i32_1 = arith.constant 0 : i32
    return %c0_i32, %c0_i32_0 : i32, i32
  }
  func.func @transform_5(%arg0: i32) -> (i32, i32) {
    %c0_i32 = arith.constant 0 : i32
    %c0_i32_0 = arith.constant 0 : i32
    return %arg0, %c0_i32 : i32, i32
  }
}

</mosaic_0001>

<bundles_post_ra>
// kernel: mlp_forward.1
= control target key start
LH: loop header
LB: loop body
LE: loop exit
PB: predicated region body
PF: predicated region fallthrough
CT: control target
= control target key end

     0   :  { %v358_v0 = vmov 0.0   ;;  %vm359_vm0 = vmmov 0   ;;  %s453_s1 = inlined_call_operand.vmem [shape: bf16[128,128], index: 1, kind: input, shape index: {}]   ;;  %s454_s3 = inlined_call_operand.vmem [shape: bf16[128,128], index: 3, kind: input, shape index: {}]   ;;  %s455_s0 = inlined_call_operand.vmem [shape: bf16[16,128], index: 0, kind: input, shape index: {}]   ;;  %s456_s2 = inlined_call_operand.vmem [shape: f32[1,128], index: 2, kind: input, shape index: {}]   ;;  %s457_s4 = inlined_call_operand.vmem [shape: f32[1,128], index: 4, kind: input, shape index: {}]   ;;  %s458_s5 = inlined_call_operand.vmem [shape: f32[16,128], index: 5, kind: output, shape index: {}]  }
   0x1   :  { %299 = vmatprep.subr.bf16.mxu0 %v358_v0  ;;  %v341_v1 = vld [vmem:[%s453_s1] sm:$0xff]   ;;  %315 = vmatprep.mubr.msk.bf16.mxu0 %vm359_vm0, %v358_v0  ;;  %v342_v2 = vld [vmem:[%s453_s1 + $0x8] sm:$0xff]   ;;  %v343_v3 = vld [vmem:[%s453_s1 + $0x10] sm:$0xff]  }
   0x2   :  { %319 = vmatprep.subr.bf16.mxu1 %v358_v0  ;;  %335 = vmatprep.mubr.msk.bf16.mxu1 %vm359_vm0, %v358_v0  ;;  %v350_v4 = vld [vmem:[%s454_s3] sm:$0xff]   ;;  %v344_v5 = vld [vmem:[%s453_s1 + $0x18] sm:$0xff]   ;;  %v351_v6 = vld [vmem:[%s454_s3 + $0x8] sm:$0xff]  }
   0x3   :  { %300 = vmatpush3.bf16.msra.mxu0 %v341_v1  ;;  %320 = vmatpush3.bf16.msra.mxu1 %v350_v4  ;;  %v345_v7 = vld [vmem:[%s453_s1 + $0x20] sm:$0xff]   ;;  %v352_v8 = vld [vmem:[%s454_s3 + $0x10] sm:$0xff]   ;;  %v346_v9 = vld [vmem:[%s453_s1 + $0x28] sm:$0xff]  }
   0x4   :  { %301 = vmatprep.subr.bf16.mxu0 %v358_v0  ;;  %321 = vmatprep.subr.bf16.mxu1 %v358_v0  ;;  %v353_v10 = vld [vmem:[%s454_s3 + $0x18] sm:$0xff]   ;;  %v347_v11 = vld [vmem:[%s453_s1 + $0x30] sm:$0xff]   ;;  %v354_v12 = vld [vmem:[%s454_s3 + $0x20] sm:$0xff]  }
   0x5   :  { %v348_v13 = vld [vmem:[%s453_s1 + $0x38] sm:$0xff]   ;;  %v355_v14 = vld [vmem:[%s454_s3 + $0x28] sm:$0xff]   ;;  %v349_v15 = vld [vmem:[%s455_s0] sm:$0xff]  }
   0x6   :  { %v356_v16 = vld [vmem:[%s454_s3 + $0x30] sm:$0xff]   ;;  %v357_v17 = vld [vmem:[%s454_s3 + $0x38] sm:$0xff]   ;;  %v262_v18 = vld [vmem:[%s456_s2] ss:$0 sm:$0xff] }
   0x7   :  { %302 = vmatpush3.bf16.msra.mxu0 %v342_v2  ;;  %322 = vmatpush3.bf16.msra.mxu1 %v351_v6  ;;  %v272_v28 = vld [vmem:[%s457_s4] ss:$0 sm:$0xff] }
   0x8   :  { %303 = vmatprep.subr.bf16.mxu0 %v358_v0  ;;  %323 = vmatprep.subr.bf16.mxu1 %v358_v0 }
   0xb   :  { %304 = vmatpush3.bf16.msra.mxu0 %v343_v3  ;;  %324 = vmatpush3.bf16.msra.mxu1 %v352_v8 }
   0xc   :  { %305 = vmatprep.subr.bf16.mxu0 %v358_v0  ;;  %325 = vmatprep.subr.bf16.mxu1 %v358_v0 }
   0xf   :  { %306 = vmatpush3.bf16.msra.mxu0 %v344_v5  ;;  %326 = vmatpush3.bf16.msra.mxu1 %v353_v10 }
  0x10   :  { %307 = vmatprep.subr.bf16.mxu0 %v358_v0  ;;  %327 = vmatprep.subr.bf16.mxu1 %v358_v0 }
  0x13   :  { %308 = vmatpush3.bf16.msra.mxu0 %v345_v7  ;;  %328 = vmatpush3.bf16.msra.mxu1 %v354_v12 }
  0x14   :  { %309 = vmatprep.subr.bf16.mxu0 %v358_v0  ;;  %329 = vmatprep.subr.bf16.mxu1 %v358_v0 }
  0x17   :  { %310 = vmatpush3.bf16.msra.mxu0 %v346_v9  ;;  %330 = vmatpush3.bf16.msra.mxu1 %v355_v14 }
  0x18   :  { %311 = vmatprep.subr.bf16.mxu0 %v358_v0  ;;  %331 = vmatprep.subr.bf16.mxu1 %v358_v0 }
  0x1b   :  { %312 = vmatpush3.bf16.msra.mxu0 %v347_v11  ;;  %332 = vmatpush3.bf16.msra.mxu1 %v356_v16 }
  0x1c   :  { %313 = vmatprep.subr.bf16.mxu0 %v358_v0  ;;  %333 = vmatprep.subr.bf16.mxu1 %v358_v0 }
  0x1f   :  { %314 = vmatpush3.bf16.msra.mxu0 %v348_v13  ;;  %334 = vmatpush3.bf16.msra.mxu1 %v357_v17 }
  0x22   :  { %316 = vmatmul.mubr.bf16.vlgmr.msra.gmra.mrb[0].mxu0 %v349_v15 }
  0xf5   :  { %v134_v19 = vpop.f32.mrb[0].mxu0 }
  0xf6   :  { %v135_v20 = vadd.f32 %v262_v18, %v134_v19  ;;  %v317_v21 = vpop.f32.mrb[1].mxu0 }
  0xf7   :  { %v137_v22 = vpop.f32.mrb[2].mxu0 }
  0xf8   :  { %v138_v23 = vadd.f32 %v262_v18, %v137_v22  ;;  %v318_v24 = vpop.f32.mrb[3].mxu0  ;;  %v141_v25 = vmax.f32 %v135_v20, 0.0 }
  0xfa   :  { %v142_v26 = vmax.f32 %v138_v23, 0.0 }
  0xfc   :  { %v143_v27 = vpack.c.bf16 %v142_v26, %v141_v25 }
  0xfe   :  { %336 = vmatmul.mubr.bf16.vlgmr.msra.gmra.mrb[0].mxu1 %v143_v27 }
 0x1d1   :  { %v249_v29 = vpop.f32.mrb[0].mxu1 }
 0x1d2   :  { %v250_v30 = vadd.f32 %v272_v28, %v249_v29  ;;  %v337_v31 = vpop.f32.mrb[1].mxu1 }
 0x1d3   :  { %v252_v32 = vpop.f32.mrb[2].mxu1 }
 0x1d4   :  { %256 = vst [vmem:[%s458_s5] sm:$0xff] %v250_v30  ;;  %v253_v33 = vadd.f32 %v272_v28, %v252_v32  ;;  %v338_v34 = vpop.f32.mrb[3].mxu1 }
 0x1d6   :  { %257 = vst [vmem:[%s458_s5 + $0x8] sm:$0xff] %v253_v33 }

</bundles_post_ra>
